<compile_context>
chip_gen: v7x
topology: tpu7x:2x2x1
jax: 0.10.0
libtpu: 0.0.40
codegen_flags: <defaults>
</compile_context>

<pallas_src>
import jax
import jax.numpy as jnp
from jax.experimental import pallas as pl
from jax.experimental.pallas import tpu as pltpu

MATMUL_DTYPE = jnp.bfloat16


def _round_up(x, m):
    return (x + m - 1) // m * m


def _physical_vmem_bytes():
    # Generation-aware physical VMEM (v5e/v6e: 128 MiB, v7x: 64 MiB).
    try:
        return int(pltpu.get_tpu_info().vmem_capacity_bytes)
    except Exception:
        return 64 << 20          # conservative fallback (v7x)


def _vmem_limit(bytes_needed):
    phys = _physical_vmem_bytes()
    limit = int(1.5 * bytes_needed) + (4 << 20)
    limit = max(limit, 16 << 20)
    return int(min(limit, 0.6 * phys))


# ----------------------------------------------------------------------------
# Kernel 1: fused weighted merge + threshold of the two multiplex stacks.
#   merged(A) = where(sum_k wb[k] * A[k] < 0.015, 0, .)   (and B with 0.15)
# ----------------------------------------------------------------------------
def merge_threshold_adjacency(A, B, wb, wc, *, thr_a, thr_b, out_dtype):
    K, na, _ = A.shape
    _, nb, _ = B.shape

    def kernel(a_ref, b_ref, wb_ref, wc_ref, ma_ref, mb_ref):
        def merged(stk_ref, w_ref, thr):
            acc = w_ref[0, 0] * stk_ref[0]
            for k in range(1, K):                       # K == 3, unrolled
                acc = acc + w_ref[k, 0] * stk_ref[k]
            # threshold compared in f32, then rounded to the matmul dtype
            return jnp.where(acc < thr, 0.0, acc)

        ma_ref[...] = merged(a_ref, wb_ref, thr_a).astype(ma_ref.dtype)
        mb_ref[...] = merged(b_ref, wc_ref, thr_b).astype(mb_ref.dtype)

    elems = na * na + nb * nb
    bytes_accessed = 4 * K * elems + jnp.dtype(out_dtype).itemsize * elems

    return pl.pallas_call(
        kernel,
        out_shape=(jax.ShapeDtypeStruct((na, na), out_dtype),
                   jax.ShapeDtypeStruct((nb, nb), out_dtype)),
        in_specs=[
            pl.BlockSpec(memory_space=pltpu.MemorySpace.VMEM),   # A stack (whole)
            pl.BlockSpec(memory_space=pltpu.MemorySpace.VMEM),   # B stack (whole)
            pl.BlockSpec(memory_space=pltpu.MemorySpace.SMEM),   # (3,1) weight_b
            pl.BlockSpec(memory_space=pltpu.MemorySpace.SMEM),   # (3,1) weight_c
        ],
        cost_estimate=pl.CostEstimate(flops=2 * K * elems,
                                      transcendentals=0,
                                      bytes_accessed=int(bytes_accessed)),
        compiler_params=pltpu.CompilerParams(
            vmem_limit_bytes=_vmem_limit(int(bytes_accessed))),
    )(A, B, wb, wc)


# ----------------------------------------------------------------------------
# Kernel 2: all GCN layers + weighted layer combination, fused.
#   per layer l:  U_l = adj @ (h @ W_l) + b_l ;  h <- U_l ;  H += f_l * U_l
# The adjacency and the hidden state are resident in SINGLE-buffered VMEM
# scratch (manual DMA at l == 0); only the small per-layer W_l / b_l blocks
# go through the default pipelined BlockSpec path.
# ----------------------------------------------------------------------------
def mhgcn_layers(adj_p, feat_p, W_stack, b_stack, f_w):
    L, Fp, Op = W_stack.shape
    Tp = adj_p.shape[0]

    def kernel(adj_hbm, feat_hbm, w_ref, b_ref, f_ref, out_ref,
               adj_vmem, h_ref, sem):
        l = pl.program_id(0)

        @pl.when(l == 0)
        def _load_resident():
            cp_adj = pltpu.make_async_copy(adj_hbm, adj_vmem, sem.at[0])
            cp_ft = pltpu.make_async_copy(feat_hbm, h_ref, sem.at[1])
            cp_adj.start()
            cp_ft.start()
            cp_adj.wait()
            cp_ft.wait()

        # support = h @ W_l          (bf16 MXU operands, f32 accumulation)
        support = jnp.dot(h_ref[...], w_ref[0].astype(MATMUL_DTYPE),
                          preferred_element_type=jnp.float32)
        # U_l = adj @ support + b_l
        u = jnp.dot(adj_vmem[...], support.astype(MATMUL_DTYPE),
                    preferred_element_type=jnp.float32) + b_ref[0]

        # carry U_l as the next layer's input features (bf16 hidden state)
        if Fp == Op:
            h_ref[...] = u.astype(h_ref.dtype)
        else:
            # stale columns >= Op only ever multiply zero-padded weight rows
            h_ref[:, :Op] = u.astype(h_ref.dtype)

        fl = f_ref[l, 0]

        @pl.when(l == 0)
        def _first():
            out_ref[...] = fl * u

        @pl.when(l != 0)
        def _rest():
            out_ref[...] = out_ref[...] + fl * u

    itemsize = jnp.dtype(MATMUL_DTYPE).itemsize
    resident_bytes = (Tp * Tp * itemsize            # adjacency scratch
                      + Tp * Fp * itemsize          # hidden-state scratch
                      + 2 * Tp * Op * 4             # H output block (pipelined)
                      + 2 * (Fp * Op + Op) * 4)     # W_l / b_l blocks
    bytes_accessed = (Tp * Tp * itemsize + Tp * Fp * itemsize
                      + L * (Fp * Op + Op) * 4 + Tp * Op * 4)

    return pl.pallas_call(
        kernel,
        out_shape=jax.ShapeDtypeStruct((Tp, Op), jnp.float32),
        grid=(L,),
        in_specs=[
            pl.BlockSpec(memory_space=pl.ANY),                   # adjacency (HBM)
            pl.BlockSpec(memory_space=pl.ANY),                   # features  (HBM)
            pl.BlockSpec((1, Fp, Op), lambda l: (l, 0, 0)),      # W_l
            pl.BlockSpec((1, 1, Op), lambda l: (l, 0, 0)),       # b_l
            pl.BlockSpec(memory_space=pltpu.MemorySpace.SMEM),   # (L,1) layer scalars
        ],
        out_specs=pl.BlockSpec((Tp, Op), lambda l: (0, 0)),      # H accumulator
        scratch_shapes=[
            pltpu.VMEM((Tp, Tp), MATMUL_DTYPE),                  # resident adjacency
            pltpu.VMEM((Tp, Fp), MATMUL_DTYPE),                  # resident hidden state
            pltpu.SemaphoreType.DMA((2,)),
        ],
        cost_estimate=pl.CostEstimate(
            flops=2 * L * (Tp * Tp * Op + Tp * Fp * Op),
            transcendentals=0,
            bytes_accessed=int(bytes_accessed)),
        compiler_params=pltpu.CompilerParams(
            dimension_semantics=("arbitrary",),
            vmem_limit_bytes=_vmem_limit(int(resident_bytes))),
    )(adj_p, feat_p, W_stack, b_stack, f_w)


# ----------------------------------------------------------------------------
# MHGCN module (parameter setup + padding glue in JAX, compute in Pallas)
# ----------------------------------------------------------------------------
class MHGCN:
    def __init__(self, nfeat, nhid, out, dropout, stdv, layer, key):
        del nhid, dropout                      # unused in forward
        self.out_dim = out
        self.layer = layer
        keys = jax.random.split(key, 12)

        def gc_params(k, fin, fout):
            kw, kb = jax.random.split(k)
            w = jax.random.uniform(kw, (fin, fout), jnp.float32, -stdv, stdv)
            b = jax.random.uniform(kb, (fout,), jnp.float32, -stdv, stdv)
            return w, b

        # gc1 .. gc5
        self.gc = [gc_params(keys[i], nfeat if i == 0 else out, out) for i in range(5)]
        # adjacency merge weights
        self.weight_b = jax.random.uniform(keys[5], (3, 1), jnp.float32, 0.08, 0.12)
        self.weight_c = jax.random.uniform(keys[6], (3, 1), jnp.float32, 0.08, 0.12)
        # per-layer combination scalars (weight_f, weight_f1..weight_f4)
        self.weight_f = jnp.stack([
            jax.random.uniform(keys[7], (), jnp.float32, 0.9, 1.05),
            jax.random.uniform(keys[8], (), jnp.float32, 0.1, 0.3),
            jax.random.uniform(keys[9], (), jnp.float32, 0.4, 0.5),
            jax.random.uniform(keys[10], (), jnp.float32, 0.4, 0.5),
            jax.random.uniform(keys[11], (), jnp.float32, 0.4, 0.5),
        ]).reshape(5, 1)

    def __call__(self, feature, A, B, o_ass, layer):
        na, nb = A.shape[1], B.shape[1]
        T = na + nb
        nfeat = feature.shape[1]
        out = self.out_dim
        T_p = _round_up(T, 128)
        Op = _round_up(out, 128)
        Fp = max(_round_up(nfeat, 128), Op)

        # --- weighted merge + threshold of the adjacency stacks (Pallas) ----
        mA, mB = merge_threshold_adjacency(
            A.astype(jnp.float32), B.astype(jnp.float32),
            self.weight_b, self.weight_c,
            thr_a=0.015, thr_b=0.15, out_dtype=MATMUL_DTYPE)

        # --- block-matrix assembly in the ORIGINAL (identity) node ordering.
        #   final = [[ o_ass   merged(A)       ]      rows: A-set then B-set
        #            [ mB      flip(o_ass^T)   ]]     cols: B-set then A-set
        # Identity ordering (trailing zero padding only) keeps adjacency
        # columns aligned with feature / hidden rows across every layer.
        o_bf = o_ass.astype(MATMUL_DTYPE)
        oF_bf = jnp.flip(o_ass.T, axis=(0, 1)).astype(MATMUL_DTYPE)
        final = jnp.concatenate([
            jnp.concatenate([o_bf, mA], axis=1),       # (na, nb+na)
            jnp.concatenate([mB, oF_bf], axis=1),      # (nb, nb+na)
        ], axis=0)
        adj_p = jnp.pad(final, ((0, T_p - T), (0, T_p - T)))

        # --- features in bf16 (MXU operand dtype), trailing zero padding ----
        feat_p = jnp.pad(feature.astype(MATMUL_DTYPE),
                         ((0, T_p - T), (0, Fp - nfeat)))

        # --- per-layer parameter stacks (padding MUST stay zero) -------------
        Ws, bs = [], []
        for i in range(layer):
            w, b = self.gc[i]
            Ws.append(jnp.pad(w, ((0, Fp - w.shape[0]), (0, Op - w.shape[1]))))
            bs.append(jnp.pad(b, (0, Op - b.shape[0])).reshape(1, Op))
        W_stack = jnp.stack(Ws, axis=0)                 # (L, Fp, Op)
        b_stack = jnp.stack(bs, axis=0)                 # (L, 1, Op)
        f_w = self.weight_f[:layer]                     # (L, 1)

        # --- all GCN layers + weighted combination (fused Pallas kernel) ----
        H_p = mhgcn_layers(adj_p, feat_p, W_stack, b_stack, f_w)

        # un-pad: identity layout, so rows [0, T) are the real nodes
        return H_p[:T, :out]


# ----------------------------------------------------------------------------
# Pure-JAX f32 reference (mirrors the PyTorch forward) for a sanity check.
# ----------------------------------------------------------------------------
def reference_forward(model, feature, A, B, o_ass, layer):
    wb, wc = model.weight_b, model.weight_c
    mA = wb[0, 0] * A[0] + wb[1, 0] * A[1] + wb[2, 0] * A[2]
    mA = jnp.where(mA < 0.015, 0.0, mA)
    mB = wc[0, 0] * B[0] + wc[1, 0] * B[1] + wc[2, 0] * B[2]
    mB = jnp.where(mB < 0.15, 0.0, mB)
    adj1 = jnp.concatenate([o_ass, mB], axis=0)
    adj2 = jnp.concatenate([mA, jnp.flip(o_ass.T, axis=(0, 1))], axis=0)
    final = jnp.concatenate([adj1, adj2], axis=1)
    h = feature.astype(jnp.float32)
    H = None
    for i in range(layer):
        w, b = model.gc[i]
        h = final @ (h @ w) + b
        H = model.weight_f[i, 0] * h if H is None else H + model.weight_f[i, 0] * h
    return H


if __name__ == "__main__":
    key = jax.random.PRNGKey(0)
    na, nb = 8, 16               # node-set sizes (383 / 495 at paper scale)
    nfeat, out_dim, layer = 32, 16, 3
    k1, k2, k3, k4, k5 = jax.random.split(key, 5)

    A = jax.random.uniform(k1, (3, na, na), jnp.float32)      # 3 adjacencies, set A
    B = jax.random.uniform(k2, (3, nb, nb), jnp.float32)      # 3 adjacencies, set B
    o_ass = jax.random.uniform(k3, (na, nb), jnp.float32)     # cross association
    feature = jax.random.uniform(k4, (na + nb, nfeat), jnp.float32)

    model = MHGCN(nfeat=nfeat, nhid=32, out=out_dim, dropout=0.5,
                  stdv=0.1, layer=layer, key=k5)

    H = model(feature, A, B, o_ass, layer)
    jax.block_until_ready(H)
    assert H.shape == (na + nb, out_dim)

    # sanity check vs pure-JAX f32 reference (loose: adjacency / features /
    # hidden state are bf16 and the MXU accumulates in f32, while the torch
    # reference even runs the adjacency matmul in f64)
    H_ref = reference_forward(model, feature, A, B, o_ass, layer)
    tol = 0.05 + 0.05 * float(jnp.max(jnp.abs(H_ref)))
    err = float(jnp.max(jnp.abs(H - H_ref)))
    assert err < tol, f"max abs error vs reference too large: {err} (tol {tol})"

    print("KERNEL_OK")
</pallas_src>

<mosaic_0001>
module attributes {stable_mosaic.version = 11 : i64} {
  func.func @kernel(%arg0: memref<3x8x8xf32, #tpu.memory_space<vmem>>, %arg1: memref<3x16x16xf32, #tpu.memory_space<vmem>>, %arg2: memref<3x1xf32, #tpu.memory_space<smem>>, %arg3: memref<3x1xf32, #tpu.memory_space<smem>>, %arg4: memref<8x8xbf16, #tpu.memory_space<vmem>>, %arg5: memref<16x16xbf16, #tpu.memory_space<vmem>>) attributes {dimension_semantics = [], scalar_prefetch = 0 : i64, scratch_operands = 0 : i64, tpu.core_type = #tpu.core_type<tc>} {
    %c0 = arith.constant 0 : index
    %c0_0 = arith.constant 0 : index
    %0 = memref.load %arg2[%c0, %c0_0] : memref<3x1xf32, #tpu.memory_space<smem>>
    %c0_1 = arith.constant 0 : index
    %c0_2 = arith.constant 0 : index
    %c0_3 = arith.constant 0 : index
    %1 = vector.load %arg0[%c0_1, %c0_2, %c0_3] : memref<3x8x8xf32, #tpu.memory_space<vmem>>, vector<1x8x8xf32>
    %2 = vector.shape_cast %1 : vector<1x8x8xf32> to vector<8x8xf32>
    %3 = vector.broadcast %0 : f32 to vector<8x8xf32>
    %4 = arith.mulf %3, %2 : vector<8x8xf32>
    %c1 = arith.constant 1 : index
    %c0_4 = arith.constant 0 : index
    %5 = memref.load %arg2[%c1, %c0_4] : memref<3x1xf32, #tpu.memory_space<smem>>
    %c1_5 = arith.constant 1 : index
    %c0_6 = arith.constant 0 : index
    %c0_7 = arith.constant 0 : index
    %6 = vector.load %arg0[%c1_5, %c0_6, %c0_7] : memref<3x8x8xf32, #tpu.memory_space<vmem>>, vector<1x8x8xf32>
    %7 = vector.shape_cast %6 : vector<1x8x8xf32> to vector<8x8xf32>
    %8 = vector.broadcast %5 : f32 to vector<8x8xf32>
    %9 = arith.mulf %8, %7 : vector<8x8xf32>
    %10 = arith.addf %4, %9 : vector<8x8xf32>
    %c2 = arith.constant 2 : index
    %c0_8 = arith.constant 0 : index
    %11 = memref.load %arg2[%c2, %c0_8] : memref<3x1xf32, #tpu.memory_space<smem>>
    %c2_9 = arith.constant 2 : index
    %c0_10 = arith.constant 0 : index
    %c0_11 = arith.constant 0 : index
    %12 = vector.load %arg0[%c2_9, %c0_10, %c0_11] : memref<3x8x8xf32, #tpu.memory_space<vmem>>, vector<1x8x8xf32>
    %13 = vector.shape_cast %12 : vector<1x8x8xf32> to vector<8x8xf32>
    %14 = vector.broadcast %11 : f32 to vector<8x8xf32>
    %15 = arith.mulf %14, %13 : vector<8x8xf32>
    %16 = arith.addf %10, %15 : vector<8x8xf32>
    %cst = arith.constant 1.500000e-02 : f32
    %17 = vector.broadcast %cst : f32 to vector<8x8xf32>
    %18 = arith.cmpf olt, %16, %17 : vector<8x8xf32>
    %cst_12 = arith.constant 0.000000e+00 : f32
    %19 = vector.broadcast %cst_12 : f32 to vector<8x8xf32>
    %20 = arith.select %18, %19, %16 : vector<8x8xi1>, vector<8x8xf32>
    %21 = arith.truncf %20 : vector<8x8xf32> to vector<8x8xbf16>
    %c0_13 = arith.constant 0 : index
    %c0_14 = arith.constant 0 : index
    %22 = vector.load %arg4[%c0_13, %c0_14] : memref<8x8xbf16, #tpu.memory_space<vmem>>, vector<8x8xbf16>
    tpu.vector_store %arg4[%c0_13, %c0_14], %21 {strides = array<i32>} : memref<8x8xbf16, #tpu.memory_space<vmem>>, vector<8x8xbf16>,
    %c0_15 = arith.constant 0 : index
    %c0_16 = arith.constant 0 : index
    %23 = memref.load %arg3[%c0_15, %c0_16] : memref<3x1xf32, #tpu.memory_space<smem>>
    %c0_17 = arith.constant 0 : index
    %c0_18 = arith.constant 0 : index
    %c0_19 = arith.constant 0 : index
    %24 = vector.load %arg1[%c0_17, %c0_18, %c0_19] : memref<3x16x16xf32, #tpu.memory_space<vmem>>, vector<1x16x16xf32>
    %25 = vector.shape_cast %24 : vector<1x16x16xf32> to vector<16x16xf32>
    %26 = vector.broadcast %23 : f32 to vector<16x16xf32>
    %27 = arith.mulf %26, %25 : vector<16x16xf32>
    %c1_20 = arith.constant 1 : index
    %c0_21 = arith.constant 0 : index
    %28 = memref.load %arg3[%c1_20, %c0_21] : memref<3x1xf32, #tpu.memory_space<smem>>
    %c1_22 = arith.constant 1 : index
    %c0_23 = arith.constant 0 : index
    %c0_24 = arith.constant 0 : index
    %29 = vector.load %arg1[%c1_22, %c0_23, %c0_24] : memref<3x16x16xf32, #tpu.memory_space<vmem>>, vector<1x16x16xf32>
    %30 = vector.shape_cast %29 : vector<1x16x16xf32> to vector<16x16xf32>
    %31 = vector.broadcast %28 : f32 to vector<16x16xf32>
    %32 = arith.mulf %31, %30 : vector<16x16xf32>
    %33 = arith.addf %27, %32 : vector<16x16xf32>
    %c2_25 = arith.constant 2 : index
    %c0_26 = arith.constant 0 : index
    %34 = memref.load %arg3[%c2_25, %c0_26] : memref<3x1xf32, #tpu.memory_space<smem>>
    %c2_27 = arith.constant 2 : index
    %c0_28 = arith.constant 0 : index
    %c0_29 = arith.constant 0 : index
    %35 = vector.load %arg1[%c2_27, %c0_28, %c0_29] : memref<3x16x16xf32, #tpu.memory_space<vmem>>, vector<1x16x16xf32>
    %36 = vector.shape_cast %35 : vector<1x16x16xf32> to vector<16x16xf32>
    %37 = vector.broadcast %34 : f32 to vector<16x16xf32>
    %38 = arith.mulf %37, %36 : vector<16x16xf32>
    %39 = arith.addf %33, %38 : vector<16x16xf32>
    %cst_30 = arith.constant 1.500000e-01 : f32
    %40 = vector.broadcast %cst_30 : f32 to vector<16x16xf32>
    %41 = arith.cmpf olt, %39, %40 : vector<16x16xf32>
    %cst_31 = arith.constant 0.000000e+00 : f32
    %42 = vector.broadcast %cst_31 : f32 to vector<16x16xf32>
    %43 = arith.select %41, %42, %39 : vector<16x16xi1>, vector<16x16xf32>
    %44 = arith.truncf %43 : vector<16x16xf32> to vector<16x16xbf16>
    %c0_32 = arith.constant 0 : index
    %c0_33 = arith.constant 0 : index
    %45 = vector.load %arg5[%c0_32, %c0_33] : memref<16x16xbf16, #tpu.memory_space<vmem>>, vector<16x16xbf16>
    tpu.vector_store %arg5[%c0_32, %c0_33], %44 {strides = array<i32>} : memref<16x16xbf16, #tpu.memory_space<vmem>>, vector<16x16xbf16>,
    return
  }
}

</mosaic_0001>

<bundles_post_ra>
// kernel: tpu_custom_call.1
= control target key start
LH: loop header
LB: loop body
LE: loop exit
PB: predicated region body
PF: predicated region fallthrough
CT: control target
= control target key end

     0   :  { %11 = vsyncpa [#allocation3], 0  ;;  %s413_s0 = inlined_call_operand.hbm [shape: f32[3,8,8], index: 0, kind: input, shape index: {}]   ;;  %s414_s1 = inlined_call_operand.hbm [shape: f32[3,16,16], index: 1, kind: input, shape index: {}]   ;;  %s415_s2 = inlined_call_operand.vmem [shape: f32[3,1], index: 2, kind: input, shape index: {}]   ;;  %s416_s3 = inlined_call_operand.vmem [shape: f32[3,1], index: 3, kind: input, shape index: {}]   ;;  %s417_s4 = inlined_call_operand.hbm [shape: bf16[8,8], index: 4, kind: output, shape index: {0}]   ;;  %s418_s5 = inlined_call_operand.hbm [shape: bf16[16,16], index: 5, kind: output, shape index: {1}]  }
   0x1   :  { %12 = vsyncpa [#allocation7], 0 }
   0x2   :  { %13 = vsyncpa [#allocation5], 0 }
   0x3   :  { %14 = vsyncpa [#allocation10], 0 }
   0x4   :  { %15 = vsyncpa [#allocation4], 0 }
   0x5   :  { %16 = vsyncpa [#allocation13], 0  ;;  %s310_s18 = smov [#allocation2]   ;;  %s186_s22 = scalar_lea.hbm %s413_s0, 384 }
   0x6   :  { %s22_s19 = sshll.u32 %s310_s18, 4  ;;  %p187_p0 = scmp.ne.s32.totalorder %s413_s0, %s186_s22  ;;  %s23_s19 = int_to_ptr.vmem [resolvable:$true] %s22_s19 }
   0x7   :  { %p190_p1 = scmp.lt.u32.totalorder %s186_s22, %s413_s0 }
   0x9   :  { %p192_p2 = pnand %p190_p1, %p187_p0 }
   0xb   :  { %195 = shalt.err (!%p192_p2)
}
   0xc   :  { %s196_s27 = scalar_lea.vmem %s23_s19, 384  ;;  %p201_p4 = scmp.lt.s32.totalorder %s23_s19, %s23_s19 }
   0xd   :  { %p197_p3 = scmp.ne.s32.totalorder %s23_s19, %s196_s27  ;;  %p202_p5 = scmp.lt.s32.totalorder %s196_s27, %s196_s27 }
   0xf   :  { %p203_p6 = por %p202_p5, %p201_p4 }
  0x11   :  { %p204_p7 = pnand %p203_p6, %p197_p3 }
  0x13   :  { %207 = shalt.err (!%p204_p7)
}
  0x14   :  { %s311_s28 = smov 128   ;;  %s312_s29 = smov 8  }
  0x15   :  { %28 = dma.hbm_to_vmem [thread:$0]  %s413_s0, 384, %s23_s19, [#allocation3], %s311_s28, %s311_s28, %s312_s29  }
  0x16   :  { %s313_s7 = smov [#allocation6]   ;;  %s47_s11 = sshll.u32 %s415_s2, 4  ;;  %s48_s11 = int_to_ptr.vmem [resolvable:$true] %s47_s11 }
  0x17   :  { %s34_s8 = sshll.u32 %s313_s7, 4  ;;  %s208_s14 = scalar_lea.hbm %s414_s1, 768  ;;  %s35_s8 = int_to_ptr.vmem [resolvable:$true] %s34_s8 }
  0x18   :  { %p209_p8 = scmp.ne.s32.totalorder %s414_s1, %s208_s14  ;;  %p212_p9 = scmp.lt.u32.totalorder %s208_s14, %s414_s1 }
  0x1a   :  { %p214_p10 = pnand %p212_p9, %p209_p8 }
  0x1c   :  { %217 = shalt.err (!%p214_p10)
}
  0x1d   :  { %s218_s0 = scalar_lea.vmem %s35_s8, 768  ;;  %p223_p12 = scmp.lt.s32.totalorder %s35_s8, %s35_s8 }
  0x1e   :  { %p219_p11 = scmp.ne.s32.totalorder %s35_s8, %s218_s0  ;;  %p224_p13 = scmp.lt.s32.totalorder %s218_s0, %s218_s0 }
  0x20   :  { %p225_p0 = por %p224_p13, %p223_p12 }
  0x22   :  { %p226_p1 = pnand %p225_p0, %p219_p11 }
  0x24   :  { %229 = shalt.err (!%p226_p1)
}
  0x25   :  { %40 = dma.hbm_to_vmem [thread:$0]  %s414_s1, 768, %s35_s8, [#allocation7], %s311_s28, %s311_s28, %s312_s29  }
  0x26   :  { %s57_s22 = sshll.u32 %s416_s3, 4  ;;  %s230_s23 = scalar_lea.vmem %s48_s11, 64  ;;  %s58_s22 = int_to_ptr.vmem [resolvable:$true] %s57_s22 }
  0x27   :  { %p231_p2 = scmp.ne.s32.totalorder %s48_s11, %s230_s23  ;;  %p235_p3 = scmp.lt.s32.totalorder %s48_s11, %s48_s11 }
  0x28   :  { %p236_p4 = scmp.lt.s32.totalorder %s230_s23, %s230_s23 }
  0x2a   :  { %p237_p5 = por %p236_p4, %p235_p3 }
  0x2c   :  { %p238_p6 = pnand %p237_p5, %p231_p2 }
  0x2e   :  { %241 = shalt.err (!%p238_p6)
}
  0x2f   :  { %s314_s24 = smov [#allocation8]   ;;  %s242_s25 = scalar_lea.vmem %s58_s22, 64 }
  0x30   :  { %50 = dma.vmem_to_smem %s48_s11, 64, %s314_s24, [#allocation5]  }
  0x31   :  { %p243_p7 = scmp.ne.s32.totalorder %s58_s22, %s242_s25  ;;  %p247_p8 = scmp.lt.s32.totalorder %s58_s22, %s58_s22 }
  0x32   :  { %p248_p9 = scmp.lt.s32.totalorder %s242_s25, %s242_s25 }
  0x34   :  { %p249_p10 = por %p248_p9, %p247_p8 }
  0x36   :  { %p250_p11 = pnand %p249_p10, %p243_p7 }
  0x38   :  { %253 = shalt.err (!%p250_p11)
}
  0x39   :  { %s315_s1 = smov [#allocation9]  }
  0x3a   :  { %60 = dma.vmem_to_smem %s58_s22, 64, %s315_s1, [#allocation10]  }
  0x3b   :  { %298 = dma.done.wait [#allocation3], 384  }
  0x3c   :  { %299 = vsyncadd [#allocation3], 4294966912 }
  0x3d   :  { %300 = dma.done.wait [#allocation7], 768  }
  0x3e   :  { %301 = vsyncadd [#allocation7], 4294966528 }
  0x3f   :  { %302 = dma.done.wait [#allocation5], 64  }
  0x40   :  { %303 = vsyncadd [#allocation5], 4294967232 }
  0x41   :  { %304 = dma.done.wait [#allocation10], 64  }
  0x42   :  { %305 = vsyncadd [#allocation10], 4294967232 }
  0x43   :  { %73 = sfence }
  0x44   :  { %s74_s3 = sld [smem:[#allocation8]]  ;;  %v75_v0 = vld [vmem:[#allocation2] sm:$0xff]  ;;  %v80_v1 = vld [vmem:[#allocation2 + $0x8] sm:$0xff]  ;;  %v86_v2 = vld [vmem:[#allocation2 + $0x10] sm:$0xff]  ;;  %s316_s6 = smov [#allocation11]   ;;  %vm93_vm1 = vcmask 60416  }
  0x45   :  { %s168_s26 = sld [smem:[#allocation8 + $0x80]]  ;;  %v96_v3 = vld [vmem:[#allocation6] sm:$0xff]  ;;  %v103_v6 = vld [vmem:[#allocation6 + $0x10] sm:$0xff]  ;;  %v97_v8 = vld [vmem:[#allocation6 + $0x8] sm:$0xff]  ;;  %s140_s7 = sshll.u32 %s316_s6, 4  ;;  %vm131_vm3 = vcmask 125952   ;;  %s141_s7 = int_to_ptr.vmem [resolvable:$true] %s140_s7 }
  0x46   :  { %s169_s27 = sld [smem:[#allocation8 + $0x100]]  ;;  %v112_v7 = vld [vmem:[#allocation6 + $0x20] sm:$0xff]  ;;  %v104_v13 = vld [vmem:[#allocation6 + $0x18] sm:$0xff]  ;;  %v113_v14 = vld [vmem:[#allocation6 + $0x28] sm:$0xff]  ;;  %s317_s8 = smov [#allocation12]  }
  0x47   :  { %s95_s28 = sld [smem:[#allocation9]]  ;;  %s149_s9 = sshll.u32 %s317_s8, 4  ;;  %s380_s9 = int_to_ptr.vmem [resolvable:$true] %s149_s9 }
  0x48   :  { %s170_s29 = sld [smem:[#allocation9 + $0x80]]  ;;  %s254_s10 = scalar_lea.vmem %s141_s7, 64 }
  0x49   :  { %s171_s30 = sld [smem:[#allocation9 + $0x100]]  ;;  %p255_p12 = scmp.ne.s32.totalorder %s141_s7, %s254_s10 }
  0x4a   :  { %v76_v4 = vstv %s74_s3  ;;  %p259_p13 = scmp.lt.s32.totalorder %s141_s7, %s141_s7  ;;  %p260_p0 = scmp.lt.s32.totalorder %s254_s10, %s254_s10 }
  0x4b   :  { %v81_v5 = vstv %s168_s26  ;;  %v77_v9 = vmul.f32 %v76_v4, %v75_v0 }
  0x4c   :  { %v82_v10 = vmul.f32 %v81_v5, %v80_v1  ;;  %v87_v11 = vstv %s169_s27  ;;  %p261_p1 = por %p260_p0, %p259_p13 }
  0x4d   :  { %v98_v12 = vstv %s95_s28  ;;  %v88_v15 = vmul.f32 %v87_v11, %v86_v2 }
  0x4e   :  { %v99_v16 = vmul.f32 %v98_v12, %v96_v3  ;;  %v105_v17 = vstv %s170_s29  ;;  %v83_v19 = vadd.f32 %v82_v10, %v77_v9  ;;  %v100_v22 = vmul.f32 %v98_v12, %v97_v8  ;;  %p262_p2 = pnand %p261_p1, %p255_p12 }
  0x4f   :  { %v114_v18 = vstv %s171_s30  ;;  %v106_v20 = vmul.f32 %v105_v17, %v103_v6  ;;  %v107_v23 = vmul.f32 %v105_v17, %v104_v13 }
  0x50   :  { %v115_v21 = vmul.f32 %v114_v18, %v112_v7  ;;  %v116_v24 = vmul.f32 %v114_v18, %v113_v14  ;;  %v89_v25 = vadd.f32 %v88_v15, %v83_v19 }
  0x51   :  { %v108_v26 = vadd.f32 %v106_v20, %v99_v16  ;;  %v109_v27 = vadd.f32 %v107_v23, %v100_v22 }
  0x52   :  { %vm90_vm0 = vcmp.lt.f32.partialorder %v89_v25, 0.015 }
  0x53   :  { %v117_v28 = vadd.f32 %v115_v21, %v108_v26  ;;  %v91_v29 = vsel %vm90_vm0, 0.0, %v89_v25  ;;  %v118_v30 = vadd.f32 %v116_v24, %v109_v27 }
  0x54   :  { %v92_v31 = vpack.c.bf16 %v91_v29, %v91_v29 }
  0x55   :  { %vm119_vm2 = vcmp.lt.f32.partialorder %v117_v28, 0.15  ;;  %vm120_vm4 = vcmp.lt.f32.partialorder %v118_v30, 0.15 }
  0x56   :  { %v121_v32 = vsel %vm119_vm2, 0.0, %v117_v28  ;;  %94 = vst.msk [vmem:[#allocation11] sm:$0xf] %vm93_vm1, %v92_v31  ;;  %v122_v34 = vsel %vm120_vm4, 0.0, %v118_v30 }
  0x57   :  { %v174_v33 = vpack.c.bf16 %v121_v32, %v121_v32  ;;  %v175_v35 = vpack.c.bf16 %v122_v34, %v122_v34 }
  0x58   :  { %265 = shalt.err (!%p262_p2)
}
  0x59   :  { %s266_s13 = scalar_lea.hbm %s417_s4, 64 }
  0x5a   :  { %p267_p3 = scmp.ne.s32.totalorder %s417_s4, %s266_s13  ;;  %p270_p4 = scmp.lt.u32.totalorder %s266_s13, %s417_s4 }
  0x5c   :  { %p272_p5 = pnand %p270_p4, %p267_p3 }
  0x5e   :  { %275 = shalt.err (!%p272_p5)
}
  0x5f   :  { %143 = dma.vmem_to_hbm [thread:$0]  %s141_s7, 64, %s417_s4, [#allocation4]   ;;  %132 = vst.msk [vmem:[#allocation12] sm:$0xf] %vm131_vm3, %v174_v33  ;;  %133 = vst.msk [vmem:[#allocation12 + $0x4] sm:$0xf] %vm131_vm3, %v175_v35 }
  0x60   :  { %s276_s2 = scalar_lea.vmem %s380_s9, 128  ;;  %p281_p7 = scmp.lt.s32.totalorder %s380_s9, %s380_s9 }
  0x61   :  { %p277_p6 = scmp.ne.s32.totalorder %s380_s9, %s276_s2  ;;  %p282_p8 = scmp.lt.s32.totalorder %s276_s2, %s276_s2 }
  0x63   :  { %p283_p9 = por %p282_p8, %p281_p7 }
  0x65   :  { %p284_p10 = pnand %p283_p9, %p277_p6 }
  0x67   :  { %287 = shalt.err (!%p284_p10)
}
  0x68   :  { %s288_s21 = scalar_lea.hbm %s418_s5, 128 }
  0x69   :  { %p289_p11 = scmp.ne.s32.totalorder %s418_s5, %s288_s21  ;;  %p292_p12 = scmp.lt.u32.totalorder %s288_s21, %s418_s5 }
  0x6b   :  { %p294_p13 = pnand %p292_p12, %p289_p11 }
  0x6d   :  { %297 = shalt.err (!%p294_p13)
}
  0x6e   :  { %s318_s25 = smov 64   ;;  %s319_s1 = smov 4  }
  0x6f   :  { %155 = dma.vmem_to_hbm [thread:$0]  %s380_s9, 128, %s418_s5, [#allocation13], %s318_s25, %s318_s25, %s319_s1  }
  0x70   :  { %306 = dma.done.wait [#allocation4], 64  }
  0x71   :  { %307 = vsyncadd [#allocation4], 4294967232 }
  0x72   :  { %308 = dma.done.wait [#allocation13], 128  }
  0x73   :  { %309 = vsyncadd [#allocation13], 4294967168 }
  0x74   :  { %162 = vsyncpa [#allocation3], 1 }
  0x75   :  { %163 = vsyncpa [#allocation7], 1 }
  0x76   :  { %164 = vsyncpa [#allocation4], 1 }
  0x77   :  { %165 = vsyncpa [#allocation13], 1 }
  0x78   :  { %166 = vsyncpa [#allocation5], 1 }
  0x79   :  { %167 = vsyncpa [#allocation10], 1 }

</bundles_post_ra>
